<compile_context>
chip_gen: v6e
topology: v6e:2x2x1
jax: 0.10.0
libtpu: 0.0.40
codegen_flags: <defaults>
</compile_context>

<pallas_src>
import numpy as np
import jax
import jax.numpy as jnp
from jax.experimental import pallas as pl
from jax.experimental.pallas import tpu as pltpu


def _disparity_regression_kernel(x_ref, o_ref):
    # x_ref: (1, D, TH, TW), o_ref: (1, TH, TW)
    d_total = x_ref.shape[1]
    if d_total >= 2:
        # d == 0 contributes nothing; d == 1 has weight 1 (no multiply needed).
        acc0 = x_ref[0, 1].astype(jnp.float32)
        acc1 = jnp.zeros_like(acc0)
        # D is a compile-time constant -> static indices, fully unrolled
        # scalar-times-tile FMA chains on the VPU (kernel is HBM-bound anyway).
        # Two accumulators keep two independent add chains for extra ILP.
        for d in range(2, d_total, 2):
            acc0 = acc0 + x_ref[0, d].astype(jnp.float32) * jnp.float32(d)
        for d in range(3, d_total, 2):
            acc1 = acc1 + x_ref[0, d].astype(jnp.float32) * jnp.float32(d)
        acc = acc0 + acc1
    else:
        acc = jnp.zeros(x_ref.shape[2:], jnp.float32)
    o_ref[0] = acc.astype(o_ref.dtype)


def _pick_tiles(D, H, W, itemsize, budget_bytes=12 * 1024 * 1024):
    """Largest legal (TH, TW) tile whose double-buffered blocks fit the budget.

    TH must be a multiple of 8 (or full H); TW a multiple of 128 (or full W).
    Full-width tiles are preferred (lane-dense output stores, fewer / more
    contiguous DMAs), then the tallest TH that fits.
    """
    th_cands = sorted({t for t in range(8, H + 1, 8) if H % t == 0} | {H},
                      reverse=True)
    tw_cands = sorted({t for t in range(128, W + 1, 128) if W % t == 0} | {W},
                      reverse=True)
    for tw in tw_cands:            # widest first
        for th in th_cands:        # then tallest
            # double-buffered input block (D*th*tw) + output block (th*tw)
            if 2 * (D + 1) * th * tw * itemsize <= budget_bytes:
                return th, tw
    return th_cands[-1], tw_cands[-1]   # smallest legal tile as a fallback


def disparity_regression(x):
    """x: (N, maxdisp, H, W) -> (N, H, W), out[n,h,w] = sum_d d * x[n,d,h,w]."""
    N, D, H, W = x.shape
    th, tw = _pick_tiles(D, H, W, x.dtype.itemsize)
    assert H % th == 0 and W % tw == 0
    grid = (N, H // th, W // tw)
    return pl.pallas_call(
        _disparity_regression_kernel,
        out_shape=jax.ShapeDtypeStruct((N, H, W), x.dtype),
        grid_spec=pltpu.PrefetchScalarGridSpec(
            num_scalar_prefetch=0,
            grid=grid,
            in_specs=[pl.BlockSpec((1, D, th, tw),
                                   lambda n, h, w: (n, 0, h, w))],
            out_specs=pl.BlockSpec((1, th, tw),
                                   lambda n, h, w: (n, h, w)),
        ),
        compiler_params=pltpu.CompilerParams(
            dimension_semantics=("parallel", "parallel", "parallel"),
            vmem_limit_bytes=32 * 1024 * 1024),
    )(x)


def ref_disparity_regression(x):
    D = x.shape[1]
    disp = jnp.arange(D, dtype=x.dtype).reshape(1, D, 1, 1)
    return jnp.sum(x * disp, axis=1)


if __name__ == "__main__":
    key = jax.random.PRNGKey(0)
    k0, k1 = jax.random.split(key)

    # Primary shape: batch=2, maxdisp=16, H=32, W=128 (lane-dense output).
    N, D, H, W = 2, 16, 32, 128
    logits = jax.random.normal(k0, (N, D, H, W), jnp.float32)
    x = jax.nn.softmax(logits, axis=1)  # typical disparity-probability input

    out = disparity_regression(x)
    jax.block_until_ready(out)
    assert out.shape == (N, H, W)
    np.testing.assert_allclose(np.asarray(out),
                               np.asarray(ref_disparity_regression(x)),
                               rtol=1e-5, atol=1e-5)

    # Second shape exercises a non-128-multiple W (masked lane edge) and the
    # tile-selection path (H not a power-of-two multiple of 8).
    N2, D2, H2, W2 = 1, 24, 40, 96
    x2 = jax.nn.softmax(jax.random.normal(k1, (N2, D2, H2, W2), jnp.float32),
                        axis=1)
    out2 = disparity_regression(x2)
    jax.block_until_ready(out2)
    assert out2.shape == (N2, H2, W2)
    np.testing.assert_allclose(np.asarray(out2),
                               np.asarray(ref_disparity_regression(x2)),
                               rtol=1e-5, atol=1e-5)

    # TODO(synk): the PyTorch `x.is_contiguous()` assert and `torch.cuda.device_of`
    # context are CUDA/layout guards with no TPU/Pallas equivalent; they are
    # intentionally dropped (semantics are unaffected).

    print("KERNEL_OK")
</pallas_src>

<mosaic_0001>
module attributes {stable_mosaic.version = 11 : i64} {
  func.func @_disparity_regression_kernel(%arg0: i32, %arg1: i32, %arg2: i32, %arg3: memref<1x16x32x128xf32, #tpu.memory_space<vmem>>, %arg4: memref<1x32x128xf32, #tpu.memory_space<vmem>>) attributes {dimension_semantics = [#tpu.dimension_semantics<parallel>, #tpu.dimension_semantics<parallel>, #tpu.dimension_semantics<parallel>], iteration_bounds = array<i64: 2, 1, 1>, scalar_prefetch = 0 : i64, scratch_operands = 0 : i64, tpu.core_type = #tpu.core_type<tc>, window_params = [{transform_indices = @transform_0, window_bounds = array<i64: 1, 16, 32, 128>}, {transform_indices = @transform_1, window_bounds = array<i64: 1, 32, 128>}]} {
    %c0 = arith.constant 0 : index
    %c1 = arith.constant 1 : index
    %c0_0 = arith.constant 0 : index
    %c0_1 = arith.constant 0 : index
    %0 = vector.load %arg3[%c0, %c1, %c0_0, %c0_1] : memref<1x16x32x128xf32, #tpu.memory_space<vmem>>, vector<1x1x32x128xf32>
    %1 = vector.shape_cast %0 : vector<1x1x32x128xf32> to vector<32x128xf32>
    %cst = arith.constant 0.000000e+00 : f32
    %2 = vector.broadcast %cst : f32 to vector<32x128xf32>
    %c0_2 = arith.constant 0 : index
    %c2 = arith.constant 2 : index
    %c0_3 = arith.constant 0 : index
    %c0_4 = arith.constant 0 : index
    %3 = vector.load %arg3[%c0_2, %c2, %c0_3, %c0_4] : memref<1x16x32x128xf32, #tpu.memory_space<vmem>>, vector<1x1x32x128xf32>
    %4 = vector.shape_cast %3 : vector<1x1x32x128xf32> to vector<32x128xf32>
    %cst_5 = arith.constant 2.000000e+00 : f32
    %5 = vector.broadcast %cst_5 : f32 to vector<32x128xf32>
    %6 = arith.mulf %4, %5 : vector<32x128xf32>
    %7 = arith.addf %1, %6 : vector<32x128xf32>
    %c0_6 = arith.constant 0 : index
    %c4 = arith.constant 4 : index
    %c0_7 = arith.constant 0 : index
    %c0_8 = arith.constant 0 : index
    %8 = vector.load %arg3[%c0_6, %c4, %c0_7, %c0_8] : memref<1x16x32x128xf32, #tpu.memory_space<vmem>>, vector<1x1x32x128xf32>
    %9 = vector.shape_cast %8 : vector<1x1x32x128xf32> to vector<32x128xf32>
    %cst_9 = arith.constant 4.000000e+00 : f32
    %10 = vector.broadcast %cst_9 : f32 to vector<32x128xf32>
    %11 = arith.mulf %9, %10 : vector<32x128xf32>
    %12 = arith.addf %7, %11 : vector<32x128xf32>
    %c0_10 = arith.constant 0 : index
    %c6 = arith.constant 6 : index
    %c0_11 = arith.constant 0 : index
    %c0_12 = arith.constant 0 : index
    %13 = vector.load %arg3[%c0_10, %c6, %c0_11, %c0_12] : memref<1x16x32x128xf32, #tpu.memory_space<vmem>>, vector<1x1x32x128xf32>
    %14 = vector.shape_cast %13 : vector<1x1x32x128xf32> to vector<32x128xf32>
    %cst_13 = arith.constant 6.000000e+00 : f32
    %15 = vector.broadcast %cst_13 : f32 to vector<32x128xf32>
    %16 = arith.mulf %14, %15 : vector<32x128xf32>
    %17 = arith.addf %12, %16 : vector<32x128xf32>
    %c0_14 = arith.constant 0 : index
    %c8 = arith.constant 8 : index
    %c0_15 = arith.constant 0 : index
    %c0_16 = arith.constant 0 : index
    %18 = vector.load %arg3[%c0_14, %c8, %c0_15, %c0_16] : memref<1x16x32x128xf32, #tpu.memory_space<vmem>>, vector<1x1x32x128xf32>
    %19 = vector.shape_cast %18 : vector<1x1x32x128xf32> to vector<32x128xf32>
    %cst_17 = arith.constant 8.000000e+00 : f32
    %20 = vector.broadcast %cst_17 : f32 to vector<32x128xf32>
    %21 = arith.mulf %19, %20 : vector<32x128xf32>
    %22 = arith.addf %17, %21 : vector<32x128xf32>
    %c0_18 = arith.constant 0 : index
    %c10 = arith.constant 10 : index
    %c0_19 = arith.constant 0 : index
    %c0_20 = arith.constant 0 : index
    %23 = vector.load %arg3[%c0_18, %c10, %c0_19, %c0_20] : memref<1x16x32x128xf32, #tpu.memory_space<vmem>>, vector<1x1x32x128xf32>
    %24 = vector.shape_cast %23 : vector<1x1x32x128xf32> to vector<32x128xf32>
    %cst_21 = arith.constant 1.000000e+01 : f32
    %25 = vector.broadcast %cst_21 : f32 to vector<32x128xf32>
    %26 = arith.mulf %24, %25 : vector<32x128xf32>
    %27 = arith.addf %22, %26 : vector<32x128xf32>
    %c0_22 = arith.constant 0 : index
    %c12 = arith.constant 12 : index
    %c0_23 = arith.constant 0 : index
    %c0_24 = arith.constant 0 : index
    %28 = vector.load %arg3[%c0_22, %c12, %c0_23, %c0_24] : memref<1x16x32x128xf32, #tpu.memory_space<vmem>>, vector<1x1x32x128xf32>
    %29 = vector.shape_cast %28 : vector<1x1x32x128xf32> to vector<32x128xf32>
    %cst_25 = arith.constant 1.200000e+01 : f32
    %30 = vector.broadcast %cst_25 : f32 to vector<32x128xf32>
    %31 = arith.mulf %29, %30 : vector<32x128xf32>
    %32 = arith.addf %27, %31 : vector<32x128xf32>
    %c0_26 = arith.constant 0 : index
    %c14 = arith.constant 14 : index
    %c0_27 = arith.constant 0 : index
    %c0_28 = arith.constant 0 : index
    %33 = vector.load %arg3[%c0_26, %c14, %c0_27, %c0_28] : memref<1x16x32x128xf32, #tpu.memory_space<vmem>>, vector<1x1x32x128xf32>
    %34 = vector.shape_cast %33 : vector<1x1x32x128xf32> to vector<32x128xf32>
    %cst_29 = arith.constant 1.400000e+01 : f32
    %35 = vector.broadcast %cst_29 : f32 to vector<32x128xf32>
    %36 = arith.mulf %34, %35 : vector<32x128xf32>
    %37 = arith.addf %32, %36 : vector<32x128xf32>
    %c0_30 = arith.constant 0 : index
    %c3 = arith.constant 3 : index
    %c0_31 = arith.constant 0 : index
    %c0_32 = arith.constant 0 : index
    %38 = vector.load %arg3[%c0_30, %c3, %c0_31, %c0_32] : memref<1x16x32x128xf32, #tpu.memory_space<vmem>>, vector<1x1x32x128xf32>
    %39 = vector.shape_cast %38 : vector<1x1x32x128xf32> to vector<32x128xf32>
    %cst_33 = arith.constant 3.000000e+00 : f32
    %40 = vector.broadcast %cst_33 : f32 to vector<32x128xf32>
    %41 = arith.mulf %39, %40 : vector<32x128xf32>
    %42 = arith.addf %2, %41 : vector<32x128xf32>
    %c0_34 = arith.constant 0 : index
    %c5 = arith.constant 5 : index
    %c0_35 = arith.constant 0 : index
    %c0_36 = arith.constant 0 : index
    %43 = vector.load %arg3[%c0_34, %c5, %c0_35, %c0_36] : memref<1x16x32x128xf32, #tpu.memory_space<vmem>>, vector<1x1x32x128xf32>
    %44 = vector.shape_cast %43 : vector<1x1x32x128xf32> to vector<32x128xf32>
    %cst_37 = arith.constant 5.000000e+00 : f32
    %45 = vector.broadcast %cst_37 : f32 to vector<32x128xf32>
    %46 = arith.mulf %44, %45 : vector<32x128xf32>
    %47 = arith.addf %42, %46 : vector<32x128xf32>
    %c0_38 = arith.constant 0 : index
    %c7 = arith.constant 7 : index
    %c0_39 = arith.constant 0 : index
    %c0_40 = arith.constant 0 : index
    %48 = vector.load %arg3[%c0_38, %c7, %c0_39, %c0_40] : memref<1x16x32x128xf32, #tpu.memory_space<vmem>>, vector<1x1x32x128xf32>
    %49 = vector.shape_cast %48 : vector<1x1x32x128xf32> to vector<32x128xf32>
    %cst_41 = arith.constant 7.000000e+00 : f32
    %50 = vector.broadcast %cst_41 : f32 to vector<32x128xf32>
    %51 = arith.mulf %49, %50 : vector<32x128xf32>
    %52 = arith.addf %47, %51 : vector<32x128xf32>
    %c0_42 = arith.constant 0 : index
    %c9 = arith.constant 9 : index
    %c0_43 = arith.constant 0 : index
    %c0_44 = arith.constant 0 : index
    %53 = vector.load %arg3[%c0_42, %c9, %c0_43, %c0_44] : memref<1x16x32x128xf32, #tpu.memory_space<vmem>>, vector<1x1x32x128xf32>
    %54 = vector.shape_cast %53 : vector<1x1x32x128xf32> to vector<32x128xf32>
    %cst_45 = arith.constant 9.000000e+00 : f32
    %55 = vector.broadcast %cst_45 : f32 to vector<32x128xf32>
    %56 = arith.mulf %54, %55 : vector<32x128xf32>
    %57 = arith.addf %52, %56 : vector<32x128xf32>
    %c0_46 = arith.constant 0 : index
    %c11 = arith.constant 11 : index
    %c0_47 = arith.constant 0 : index
    %c0_48 = arith.constant 0 : index
    %58 = vector.load %arg3[%c0_46, %c11, %c0_47, %c0_48] : memref<1x16x32x128xf32, #tpu.memory_space<vmem>>, vector<1x1x32x128xf32>
    %59 = vector.shape_cast %58 : vector<1x1x32x128xf32> to vector<32x128xf32>
    %cst_49 = arith.constant 1.100000e+01 : f32
    %60 = vector.broadcast %cst_49 : f32 to vector<32x128xf32>
    %61 = arith.mulf %59, %60 : vector<32x128xf32>
    %62 = arith.addf %57, %61 : vector<32x128xf32>
    %c0_50 = arith.constant 0 : index
    %c13 = arith.constant 13 : index
    %c0_51 = arith.constant 0 : index
    %c0_52 = arith.constant 0 : index
    %63 = vector.load %arg3[%c0_50, %c13, %c0_51, %c0_52] : memref<1x16x32x128xf32, #tpu.memory_space<vmem>>, vector<1x1x32x128xf32>
    %64 = vector.shape_cast %63 : vector<1x1x32x128xf32> to vector<32x128xf32>
    %cst_53 = arith.constant 1.300000e+01 : f32
    %65 = vector.broadcast %cst_53 : f32 to vector<32x128xf32>
    %66 = arith.mulf %64, %65 : vector<32x128xf32>
    %67 = arith.addf %62, %66 : vector<32x128xf32>
    %c0_54 = arith.constant 0 : index
    %c15 = arith.constant 15 : index
    %c0_55 = arith.constant 0 : index
    %c0_56 = arith.constant 0 : index
    %68 = vector.load %arg3[%c0_54, %c15, %c0_55, %c0_56] : memref<1x16x32x128xf32, #tpu.memory_space<vmem>>, vector<1x1x32x128xf32>
    %69 = vector.shape_cast %68 : vector<1x1x32x128xf32> to vector<32x128xf32>
    %cst_57 = arith.constant 1.500000e+01 : f32
    %70 = vector.broadcast %cst_57 : f32 to vector<32x128xf32>
    %71 = arith.mulf %69, %70 : vector<32x128xf32>
    %72 = arith.addf %67, %71 : vector<32x128xf32>
    %73 = arith.addf %37, %72 : vector<32x128xf32>
    %c0_58 = arith.constant 0 : index
    %c0_59 = arith.constant 0 : index
    %c0_60 = arith.constant 0 : index
    %74 = vector.load %arg4[%c0_58, %c0_59, %c0_60] : memref<1x32x128xf32, #tpu.memory_space<vmem>>, vector<1x32x128xf32>
    %75 = vector.shape_cast %74 : vector<1x32x128xf32> to vector<32x128xf32>
    %76 = vector.shape_cast %73 : vector<32x128xf32> to vector<1x32x128xf32>
    tpu.vector_store %arg4[%c0_58, %c0_59, %c0_60], %76 {strides = array<i32>} : memref<1x32x128xf32, #tpu.memory_space<vmem>>, vector<1x32x128xf32>,
    return
  }
  func.func @transform_0(%arg0: i32, %arg1: i32, %arg2: i32) -> (i32, i32, i32, i32) {
    %c0_i32 = arith.constant 0 : i32
    %c0_i32_0 = arith.constant 0 : i32
    return %arg0, %c0_i32, %arg1, %arg2 : i32, i32, i32, i32
  }
  func.func @transform_1(%arg0: i32, %arg1: i32, %arg2: i32) -> (i32, i32, i32) {
    %c0_i32 = arith.constant 0 : i32
    return %arg0, %arg1, %arg2 : i32, i32, i32
  }
}

</mosaic_0001>

<bundles_post_ra>
// kernel: tpu_custom_call.1
= control target key start
LH: loop header
LB: loop body
LE: loop exit
PB: predicated region body
PF: predicated region fallthrough
CT: control target
= control target key end

     0   :  { %6 = vsyncpa [#allocation3], 0  ;;  %s958_s0 = inlined_call_operand.hbm [shape: f32[2,16,32,128], index: 0, kind: input, shape index: {}]   ;;  %s959_s1 = inlined_call_operand.hbm [shape: f32[2,32,128], index: 1, kind: output, shape index: {}]  }
   0x1   :  { %8 = vsyncpa [#allocation3 + $0x1], 0 }
   0x2   :  { %9 = vsyncpa [#allocation4], 0 }
   0x3   :  { %11 = vsyncpa [#allocation4 + $0x1], 0  ;;  %s740_s6 = smov 0   ;;  %s742_s7 = smov 0  }
   0x4   :  { %s744_s8 = smov 0   ;;  %s746_s9 = smov 0  }
   0x5   :  { %s748_s10 = smov 0   ;;  %s750_s11 = smov 0  }
   0x6 LB: > { %s471_s12 = sadd.s32 4294967295, %s722_s11   ;;  %s472_s13 = sadd.s32 4294967294, %s722_s11   ;;  %s722_s11 = sphi %s750_s11, %s17_s11   ;;  %s718_s10 = sphi %s748_s10, %s970_s10   ;;  %s714_s9 = sphi %s746_s9, %s969_s9   ;;  %s710_s8 = sphi %s744_s8, %s968_s8   ;;  %s706_s7 = sphi %s742_s7, %s967_s7   ;;  %s702_s6 = sphi %s740_s6, %s966_s6  }
   0x7   : > { %s36_s14 = sadd.s32 1, %s718_s10  ;;  %s47_s15 = sadd.s32 1, %s710_s8 }
   0x8   : > { %p38_p0 = scmp.ge.s32.totalorder %s36_s14, 2  ;;  %p54_p1 = scmp.ne.s32.totalorder %s710_s8, %s706_s7 }
   0x9   : > { %p55_p2 = scmp.eq.s32.totalorder %s722_s11, 0  ;;  %p60_p3 = scmp.ne.s32.totalorder %s706_s7, %s702_s6 }
   0xa   : > { %s972_s14 = smov (%p38_p0, %s36_s14), 0  ;;  %p61_p5 = scmp.eq.s32.totalorder %s471_s12, 0 }
   0xb   : > { %p781_p4 = por %p55_p2, %p54_p1  ;;  %s40_s17 = ssub.s32 %s718_s10, %s972_s14 }
   0xc   : > { %p88_p6 = scmp.eq.s32.totalorder %s471_s12, 1  ;;  %p45_p7 = scmp.eq.s32.totalorder %s40_s17, 0 }
   0xd   : > { %p787_p8 = por %p61_p5, %p60_p3  ;;  %p94_p10 = scmp.eq.s32.totalorder %s472_s13, 1 }
   0xe   : > { %p791_p9 = por %p88_p6, %p54_p1  ;;  %p560_p13 = scmp.lt.s32.totalorder %s722_s11, 2 }
   0xf   : > { %s796_s20 = scalar_select %p45_p7, %s710_s8, %s47_s15  }
  0x10   : > { %p798_p11 = por %p94_p10, %p60_p3  ;;  %s114_s22 = sand.u32 1, %s710_s8  }
  0x11   : > { %s475_s23 = sshll.u32 %s114_s22, 9  ;;  %s546_s24 = sshll.u32 %s718_s10, 13 }
  0x12   : > { %s127_s27 = scalar_lea.hbm %s958_s0, %s546_s24  ;;  %s118_s28 = scalar_lea.vmem [#allocation2], %s475_s23 }
  0x13   : > { %s128_s29 = sshll.u32 %s118_s28, 4  ;;  %p811_p0 = pnand %p560_p13, %p781_p4  ;;  %s129_s29 = int_to_ptr.vmem [resolvable:$true] %s128_s29 }
  0x14   : > { %p478_p1 = scmp.ge.s32.totalorder %s722_s11, 1  ;;  %s115_s2 = scalar_lea.sflag [#allocation3], %s114_s22 }
  0x15   : > { %p616_p2 = pneg %p811_p0  ;;  %s627_s3 = scalar_lea.vmem %s129_s29, 8192 }
  0x16   : > { %p628_p3 = scmp.ne.s32.totalorder %s129_s29, %s627_s3  ;;  %s724_s4 = smov [#allocation2]  }
  0x17   : > { %s632_s5 = sshll.u32 %s724_s4, 4  ;;  %s633_s5 = int_to_ptr.vmem [resolvable:$false] %s632_s5 }
  0x18   : > { %p630_p5 = pnand %p628_p3, %p616_p2  ;;  %s634_s12 = scalar_lea.vmem %s633_s5, 16384 }
  0x19   : > { %p635_p7 = scmp.lt.s32.totalorder %s129_s29, %s633_s5  ;;  %p636_p10 = scmp.lt.s32.totalorder %s634_s12, %s627_s3 }
  0x1a   : > { %p631_p6 = pneg %p630_p5 }
  0x1b   : > { %p637_p12 = por %p636_p10, %p635_p7 }
  0x1d   : > { %p638_p4 = pnand %p637_p12, %p631_p6 }
  0x1f   : > { %641 = shalt.err (!%p638_p4)
}
  0x20   : > { %s725_s13 = smov 128   ;;  %s726_s15 = smov 8  }
  0x21   : > { %555 = dma.hbm_to_vmem [thread:$0]  (!%p811_p0), %s127_s27, 8192, %s129_s29, %s115_s2, %s725_s13, %s725_s13, %s726_s15  }
  0x22   : > { %p136_p13 = scmp.lt.s32.totalorder %s722_s11, 3 }
  0x24   : > { %p137_p2 = pnand %p478_p1, %p136_p13 }
  0x25   : > { %s824_s16 = sand.u32 (!%p137_p2), 1, %s706_s7  }
  0x26   : > { %140 = sbr.rel (%p137_p2) target bundleno = 99 (0x63), region = 24  ;;  %s479_s17 = sshll.u32 (!%p137_p2), %s824_s16, 9 }
  0x27   : > { %s143_s22 = scalar_lea.sflag (!%p137_p2), [#allocation3], %s824_s16  ;;  %s828_s23 = scalar_lea.vmem (!%p137_p2), [#allocation2], %s479_s17 }
  0x2b   : > { %693 = dma.done.wait (%p787_p8), %s143_s22, 8192  }
  0x2c   : > { %695 = vsyncadd (%p787_p8), %s143_s22, 4294959104  ;;  %v481_v0 = vld [vmem:[%s828_s23 + $0x20] sm:$0xff]  ;;  %v482_v26 = vld [vmem:[%s828_s23 + $0x28] sm:$0xff]  ;;  %s480_s18 = sshll.u32 %s824_s16, 5  ;;  %s547_s26 = sshll.u32 %s714_s9, 9 }
  0x2d   : > { %v485_v1 = vld [vmem:[%s828_s23 + $0x40] sm:$0xff]  ;;  %v486_v27 = vld [vmem:[%s828_s23 + $0x48] sm:$0xff]  ;;  %v487_v59 = vld [vmem:[%s828_s23 + $0x50] sm:$0xff]  ;;  %s885_s24 = scalar_lea.vmem [#allocation5], %s480_s18  ;;  %s909_s29 = scalar_lea.hbm %s959_s1, %s547_s26 }
  0x2e   : > { %v489_v2 = vld [vmem:[%s828_s23 + $0x80] sm:$0xff]  ;;  %v177_v3 = vmul.f32 2.0, %v485_v1  ;;  %v490_v28 = vld [vmem:[%s828_s23 + $0x88] sm:$0xff]  ;;  %v178_v31 = vmul.f32 2.0, %v486_v27  ;;  %v491_v60 = vld [vmem:[%s828_s23 + $0x90] sm:$0xff]  ;;  %s379_s25 = sshll.u32 %s885_s24, 4  ;;  %s904_s25 = int_to_ptr.vmem [resolvable:$true] %s379_s25 }
  0x2f   : > { %v190_v4 = vmul.f32 4.0, %v489_v2  ;;  %v493_v5 = vld [vmem:[%s828_s23 + $0xc0] sm:$0xff]  ;;  %v191_v32 = vmul.f32 4.0, %v490_v28  ;;  %v494_v33 = vld [vmem:[%s828_s23 + $0xc8] sm:$0xff]  ;;  %v483_v1 = vld [vmem:[%s828_s23 + $0x30] sm:$0xff]  ;;  %s363_s30 = scalar_lea.sflag [#allocation4], %s824_s16 }
  0x30   : > { %v497_v6 = vld [vmem:[%s828_s23 + $0x100] sm:$0xff]  ;;  %v181_v11 = vadd.f32 %v481_v0, %v177_v3  ;;  %v203_v12 = vmul.f32 6.0, %v493_v5  ;;  %v498_v34 = vld [vmem:[%s828_s23 + $0x108] sm:$0xff]  ;;  %v182_v44 = vadd.f32 %v482_v26, %v178_v31  ;;  %v204_v45 = vmul.f32 6.0, %v494_v33  ;;  %v495_v2 = vld [vmem:[%s828_s23 + $0xd0] sm:$0xff]  ;;  %s642_s2 = scalar_lea.vmem %s904_s25, 512 }
  0x31   : > { %v501_v7 = vld [vmem:[%s828_s23 + $0x140] sm:$0xff]  ;;  %v216_v23 = vmul.f32 8.0, %v497_v6  ;;  %v502_v39 = vld [vmem:[%s828_s23 + $0x148] sm:$0xff]  ;;  %v217_v56 = vmul.f32 8.0, %v498_v34  ;;  %v179_v6 = vmul.f32 2.0, %v487_v59  ;;  %v527_v31 = vld [vmem:[%s828_s23 + $0x130] sm:$0xff]  ;;  %p643_p8 = scmp.ne.s32.totalorder %s904_s25, %s642_s2 }
  0x32   : > { %v505_v8 = vld [vmem:[%s828_s23 + $0x180] sm:$0xff]  ;;  %v194_v22 = vadd.f32 %v190_v4, %v181_v11  ;;  %v229_v24 = vmul.f32 10.0, %v501_v7  ;;  %v506_v40 = vld [vmem:[%s828_s23 + $0x188] sm:$0xff]  ;;  %v195_v55 = vadd.f32 %v191_v32, %v182_v44  ;;  %v230_v57 = vmul.f32 10.0, %v502_v39  ;;  %s727_s9 = smov [#allocation5]  }
  0x33   : > { %v509_v9 = vld [vmem:[%s828_s23 + $0x1c0] sm:$0xff]  ;;  %v242_v25 = vmul.f32 12.0, %v505_v8  ;;  %v514_v41 = vld [vmem:[%s828_s23 + $0x68] sm:$0xff]  ;;  %v243_v62 = vmul.f32 12.0, %v506_v40  ;;  %v192_v7 = vmul.f32 4.0, %v491_v60  ;;  %v499_v8 = vld [vmem:[%s828_s23 + $0x110] sm:$0xff]  ;;  %p644_p12 = pnand %p643_p8, %p791_p9 }
  0x34   : > { %v513_v10 = vld [vmem:[%s828_s23 + $0x60] sm:$0xff]  ;;  %v207_v35 = vadd.f32 %v203_v12, %v194_v22  ;;  %v255_v36 = vmul.f32 14.0, %v509_v9  ;;  %v518_v46 = vld [vmem:[%s828_s23 + $0xa8] sm:$0xff]  ;;  %v269_v51 = vmul.f32 3.0, %v514_v41  ;;  %v208_v4 = vadd.f32 %v204_v45, %v195_v55  ;;  %v500_v55 = vld [vmem:[%s828_s23 + $0x118] sm:$0xff]  ;;  %s646_s3 = sshll.u32 %s727_s9, 4  ;;  %s647_s3 = int_to_ptr.vmem [resolvable:$false] %s646_s3 }
  0x35   : > { %v268_v13 = vmul.f32 3.0, %v513_v10  ;;  %v517_v14 = vld [vmem:[%s828_s23 + $0xa0] sm:$0xff]  ;;  %v522_v47 = vld [vmem:[%s828_s23 + $0xe8] sm:$0xff]  ;;  %v282_v52 = vmul.f32 5.0, %v518_v46  ;;  %p645_p0 = pneg %p644_p12  ;;  %s648_s4 = scalar_lea.vmem %s647_s3, 1024 }
  0x36   : > { %v521_v15 = vld [vmem:[%s828_s23 + $0xe0] sm:$0xff]  ;;  %v281_v17 = vmul.f32 5.0, %v517_v14  ;;  %v526_v48 = vld [vmem:[%s828_s23 + $0x128] sm:$0xff]  ;;  %v220_v49 = vadd.f32 %v216_v23, %v207_v35  ;;  %v295_v53 = vmul.f32 7.0, %v522_v47  ;;  %v309_v47 = vmul.f32 9.0, %v527_v31  ;;  %v540_v31 = vld [vmem:[%s828_s23 + $0x1f8] sm:$0xff]  ;;  %p649_p1 = scmp.lt.s32.totalorder %s904_s25, %s647_s3  ;;  %p650_p3 = scmp.lt.s32.totalorder %s648_s4, %s642_s2 }
  0x37   : > { %v525_v16 = vld [vmem:[%s828_s23 + $0x120] sm:$0xff]  ;;  %v294_v18 = vmul.f32 7.0, %v521_v15  ;;  %v510_v50 = vld [vmem:[%s828_s23 + $0x1c8] sm:$0xff]  ;;  %v286_v63 = vadd.f32 %v282_v52, %v269_v51  ;;  %v308_v0 = vmul.f32 9.0, %v526_v48  ;;  %v221_v15 = vadd.f32 %v217_v56, %v208_v4  ;;  %v535_v48 = vld [vmem:[%s828_s23 + $0x1b0] sm:$0xff] }
  0x38   : > { %v529_v19 = vld [vmem:[%s828_s23 + $0x160] sm:$0xff]  ;;  %v285_v29 = vadd.f32 %v281_v17, %v268_v13  ;;  %v307_v30 = vmul.f32 9.0, %v525_v16  ;;  %v530_v58 = vld [vmem:[%s828_s23 + $0x168] sm:$0xff]  ;;  %v233_v61 = vadd.f32 %v229_v24, %v220_v49  ;;  %v256_v10 = vmul.f32 14.0, %v510_v50  ;;  %v515_v13 = vld [vmem:[%s828_s23 + $0x70] sm:$0xff]  ;;  %p651_p5 = por %p650_p3, %p649_p1 }
  0x39   : > { %v533_v20 = vld [vmem:[%s828_s23 + $0x1a0] sm:$0xff]  ;;  %v320_v37 = vmul.f32 11.0, %v529_v19  ;;  %v534_v5 = vld [vmem:[%s828_s23 + $0x1a8] sm:$0xff]  ;;  %v299_v11 = vadd.f32 %v295_v53, %v286_v63  ;;  %v321_v12 = vmul.f32 11.0, %v530_v58  ;;  %v183_v17 = vadd.f32 %v483_v1, %v179_v6  ;;  %v519_v19 = vld [vmem:[%s828_s23 + $0xb0] sm:$0xff] }
  0x3a   : > { %v537_v21 = vld [vmem:[%s828_s23 + $0x1e0] sm:$0xff]  ;;  %v333_v38 = vmul.f32 13.0, %v533_v20  ;;  %v298_v42 = vadd.f32 %v294_v18, %v285_v29  ;;  %v246_v9 = vadd.f32 %v242_v25, %v233_v61  ;;  %v538_v16 = vld [vmem:[%s828_s23 + $0x1e8] sm:$0xff]  ;;  %v205_v18 = vmul.f32 6.0, %v495_v2  ;;  %v523_v20 = vld [vmem:[%s828_s23 + $0xf0] sm:$0xff]  ;;  %p652_p6 = pnand %p651_p5, %p645_p0 }
  0x3b   : > { %v346_v43 = vmul.f32 15.0, %v537_v21  ;;  %v312_v22 = vadd.f32 %v308_v0, %v299_v11  ;;  %v334_v23 = vmul.f32 13.0, %v534_v5  ;;  %v218_v24 = vmul.f32 8.0, %v499_v8  ;;  %v503_v25 = vld [vmem:[%s828_s23 + $0x150] sm:$0xff]  ;;  %v484_v49 = vld [vmem:[%s828_s23 + $0x38] sm:$0xff] }
  0x3c   : > { %v311_v54 = vadd.f32 %v307_v30, %v298_v42  ;;  %v259_v21 = vadd.f32 %v255_v36, %v246_v9  ;;  %v234_v27 = vadd.f32 %v230_v57, %v221_v15  ;;  %v196_v28 = vadd.f32 %v192_v7, %v183_v17  ;;  %v507_v29 = vld [vmem:[%s828_s23 + $0x190] sm:$0xff]  ;;  %v488_v36 = vld [vmem:[%s828_s23 + $0x58] sm:$0xff] }
  0x3d   : > { %v270_v30 = vmul.f32 3.0, %v515_v13  ;;  %v325_v32 = vadd.f32 %v321_v12, %v312_v22  ;;  %v347_v33 = vmul.f32 15.0, %v538_v16  ;;  %v283_v34 = vmul.f32 5.0, %v519_v19  ;;  %v511_v42 = vld [vmem:[%s828_s23 + $0x1d0] sm:$0xff]  ;;  %v496_v50 = vld [vmem:[%s828_s23 + $0xd8] sm:$0xff] }
  0x3e   : > { %v324_v3 = vadd.f32 %v320_v37, %v311_v54  ;;  %v296_v35 = vmul.f32 7.0, %v523_v20  ;;  %v492_v37 = vld [vmem:[%s828_s23 + $0x98] sm:$0xff]  ;;  %v247_v39 = vadd.f32 %v243_v62, %v234_v27  ;;  %v209_v40 = vadd.f32 %v205_v18, %v196_v28  ;;  %v539_v1 = vld [vmem:[%s828_s23 + $0x1f0] sm:$0xff] }
  0x3f   : > { %v231_v41 = vmul.f32 10.0, %v503_v25  ;;  %v338_v44 = vadd.f32 %v334_v23, %v325_v32  ;;  %v244_v45 = vmul.f32 12.0, %v507_v29  ;;  %v287_v46 = vadd.f32 %v283_v34, %v270_v30  ;;  %v516_v56 = vld [vmem:[%s828_s23 + $0x78] sm:$0xff] }
  0x40   : > { %v337_v14 = vadd.f32 %v333_v38, %v324_v3  ;;  %v260_v51 = vadd.f32 %v256_v10, %v247_v39  ;;  %v222_v52 = vadd.f32 %v218_v24, %v209_v40  ;;  %v180_v53 = vmul.f32 2.0, %v488_v36  ;;  %v520_v61 = vld [vmem:[%s828_s23 + $0xb8] sm:$0xff] }
  0x41   : > { %v193_v54 = vmul.f32 4.0, %v492_v37  ;;  %v351_v57 = vadd.f32 %v347_v33, %v338_v44  ;;  %v257_v58 = vmul.f32 14.0, %v511_v42  ;;  %v300_v59 = vadd.f32 %v296_v35, %v287_v46  ;;  %v524_v62 = vld [vmem:[%s828_s23 + $0xf8] sm:$0xff] }
  0x42   : > { %v350_v26 = vadd.f32 %v346_v43, %v337_v14  ;;  %v531_v43 = vld [vmem:[%s828_s23 + $0x170] sm:$0xff]  ;;  %v235_v63 = vadd.f32 %v231_v41, %v222_v52  ;;  %v335_v0 = vmul.f32 13.0, %v535_v48  ;;  %v184_v2 = vadd.f32 %v484_v49, %v180_v53  ;;  %v504_v7 = vld [vmem:[%s828_s23 + $0x158] sm:$0xff] }
  0x43   : > { %v322_v60 = vmul.f32 11.0, %v531_v43  ;;  %v206_v3 = vmul.f32 6.0, %v496_v50  ;;  %v355_v4 = vadd.f32 %v351_v57, %v260_v51  ;;  %v313_v5 = vadd.f32 %v309_v47, %v300_v59  ;;  %v528_v9 = vld [vmem:[%s828_s23 + $0x138] sm:$0xff] }
  0x44   : > { %v354_v38 = vadd.f32 %v350_v26, %v259_v21  ;;  %v219_v6 = vmul.f32 8.0, %v500_v55  ;;  %v271_v8 = vmul.f32 3.0, %v516_v56  ;;  %v248_v10 = vadd.f32 %v244_v45, %v235_v63  ;;  %v508_v16 = vld [vmem:[%s828_s23 + $0x198] sm:$0xff] }
  0x45   : > { %v197_v11 = vadd.f32 %v193_v54, %v184_v2  ;;  %v284_v12 = vmul.f32 5.0, %v520_v61  ;;  %v297_v13 = vmul.f32 7.0, %v524_v62  ;;  %359 = vst [vmem:[%s885_s24 + $0x8] sm:$0xff] %v355_v4  ;;  %v326_v14 = vadd.f32 %v322_v60, %v313_v5  ;;  %v532_v17 = vld [vmem:[%s828_s23 + $0x178] sm:$0xff] }
  0x46   : > { %358 = vst [vmem:[%s885_s24] sm:$0xff] %v354_v38  ;;  %v348_v15 = vmul.f32 15.0, %v539_v1  ;;  %v232_v19 = vmul.f32 10.0, %v504_v7  ;;  %v310_v21 = vmul.f32 9.0, %v528_v9  ;;  %v261_v22 = vadd.f32 %v257_v58, %v248_v10  ;;  %v512_v24 = vld [vmem:[%s828_s23 + $0x1d8] sm:$0xff] }
  0x47   : > { %v210_v18 = vadd.f32 %v206_v3, %v197_v11  ;;  %v288_v20 = vadd.f32 %v284_v12, %v271_v8  ;;  %v339_v23 = vadd.f32 %v335_v0, %v326_v14  ;;  %v536_v25 = vld [vmem:[%s828_s23 + $0x1b8] sm:$0xff]  ;;  %v245_v27 = vmul.f32 12.0, %v508_v16 }
  0x48   : > { %v323_v29 = vmul.f32 11.0, %v532_v17  ;;  %v258_v33 = vmul.f32 14.0, %v512_v24  ;;  %v336_v35 = vmul.f32 13.0, %v536_v25  ;;  %v349_v39 = vmul.f32 15.0, %v540_v31 }
  0x49   : > { %v223_v26 = vadd.f32 %v219_v6, %v210_v18  ;;  %v301_v28 = vadd.f32 %v297_v13, %v288_v20  ;;  %v352_v30 = vadd.f32 %v348_v15, %v339_v23 }
  0x4b   : > { %v236_v32 = vadd.f32 %v232_v19, %v223_v26  ;;  %v314_v34 = vadd.f32 %v310_v21, %v301_v28  ;;  %v356_v36 = vadd.f32 %v352_v30, %v261_v22 }
  0x4d   : > { %v249_v37 = vadd.f32 %v245_v27, %v236_v32  ;;  %v327_v38 = vadd.f32 %v323_v29, %v314_v34  ;;  %360 = vst [vmem:[%s885_s24 + $0x10] sm:$0xff] %v356_v36 }
  0x4f   : > { %v262_v40 = vadd.f32 %v258_v33, %v249_v37  ;;  %v340_v41 = vadd.f32 %v336_v35, %v327_v38 }
  0x51   : > { %v353_v42 = vadd.f32 %v349_v39, %v340_v41 }
  0x53   : > { %v357_v43 = vadd.f32 %v353_v42, %v262_v40 }
  0x55   : > { %361 = vst [vmem:[%s885_s24 + $0x18] sm:$0xff] %v357_v43 }
  0x56   : > { %655 = shalt.err (!%p652_p6)
}
  0x57   : > { %s656_s5 = scalar_lea.hbm %s909_s29, 512  ;;  %s660_s15 = scalar_lea.hbm %s959_s1, 1024 }
  0x58   : > { %p657_p7 = scmp.ne.s32.totalorder %s909_s29, %s656_s5  ;;  %p661_p13 = scmp.lt.s32.totalorder %s909_s29, %s959_s1 }
  0x59   : > { %p662_p2 = scmp.lt.s32.totalorder %s660_s15, %s656_s5 }
  0x5a   : > { %p658_p10 = pnand %p657_p7, %p791_p9 }
  0x5b   : > { %p663_p8 = por %p662_p2, %p661_p13 }
  0x5c   : > { %p659_p4 = pneg %p658_p10 }
  0x5e   : > { %p664_p12 = pnand %p663_p8, %p659_p4 }
  0x60   : > { %667 = shalt.err (!%p664_p12)
}
  0x61   : > { %s728_s23 = smov 128   ;;  %s729_s18 = smov 8  }
  0x62   : > { %550 = dma.vmem_to_hbm [thread:$0]  (%p791_p9), %s904_s25, 512, %s909_s29, %s363_s30, %s728_s23, %s728_s23, %s729_s18  }
  0x63 PF: > { %s394_s24 = sand.u32 1, %s702_s6   ;;  %p965_p0 = scmp.ge.s32.totalorder %s722_s11, 2 }
  0x64   : > { %s395_s26 = scalar_lea.sflag [#allocation4], %s394_s24 }
  0x65   : > { %p557_p1 = pnand %p965_p0, %p798_p11 }
  0x67   : > { %p558_p3 = pneg %p557_p1 }
  0x69   : > { %697 = dma.done.wait (%p558_p3), %s395_s26, 512  }
  0x6a   : > { %699 = vsyncadd (%p558_p3), %s395_s26, 4294966784  ;;  %s17_s11 = sadd.s32 1, %s722_s11   ;;  %s966_s6 = smov %s706_s7 }
  0x6b   : > { %p14_p5 = scmp.ge.s32.totalorder %s17_s11, 4   ;;  %s967_s7 = smov %s710_s8 }
  0x6c   : > { %s968_s8 = smov %s796_s20  ;;  %s969_s9 = smov %s718_s10 }
  0x6d   : > { %s970_s10 = smov %s972_s14  ;;  %16 = sbr.rel (!%p14_p5) target bundleno = 6 (0x6), region = 84 }
  0x72   :  { %400 = vsyncpa [#allocation3], 1 }
  0x73   :  { %402 = vsyncpa [#allocation3 + $0x1], 1 }
  0x74   :  { %403 = vsyncpa [#allocation4], 1 }
  0x75   :  { %405 = vsyncpa [#allocation4 + $0x1], 1 }

</bundles_post_ra>
